<compile_context>
chip_gen: v6e
topology: v6e:2x2x1
jax: 0.10.0
libtpu: 0.0.40
codegen_flags: <defaults>
</compile_context>

<pallas_src>
import functools

import jax
import jax.numpy as jnp
from jax.experimental import pallas as pl
from jax.experimental.pallas import tpu as pltpu

# Synaptic neuron hyper-parameters (from the module __init__).
ALPHA = 0.5
BETA = 0.5
THRESHOLD = 1.0  # snnTorch default

_LANE = 128             # TPU lane width
_MAX_LANE_TILE = 32768  # (3, 32768) f32 = 384 KiB / block -> safe on v7x VMEM too


def net_kernel(params_ref, state_ref, out_ref):
    """Fused fc1 + Synaptic-LIF update on one lane-dense (3, TILE) block.

    params_ref : SMEM (2,)        -> [w, b]
    state_ref  : VMEM (3, TILE)   -> rows: [x, syn_prev, mem_prev]
    out_ref    : VMEM (3, TILE)   -> rows: [spk, syn_new, mem_new]
    """
    w = params_ref[0]
    b = params_ref[1]

    state = state_ref[...]                # one load of the packed block
    x = state[0:1, :]
    syn_prev = state[1:2, :]
    mem_prev = state[2:3, :]

    # fc1: Linear(1,1) is a scalar fma on the VPU (no MXU push/pop).
    cur1 = x * w + b

    # Fire on the *previous* membrane potential (snnTorch init_hidden order).
    spk = (mem_prev - THRESHOLD > 0.0).astype(jnp.float32)
    reset = spk * THRESHOLD

    syn_new = ALPHA * syn_prev + cur1
    mem_new = BETA * mem_prev + syn_new - reset

    # Single packed, lane-dense store.
    out_ref[...] = jnp.concatenate([spk, syn_new, mem_new], axis=0)


@functools.partial(jax.jit, static_argnames=())
def net_forward(x, w, b, syn0, mem0):
    """Pallas wrapper.

    x, syn0, mem0 : (B, 1) f32;  w, b : (1, 1) f32.
    Returns (spk, syn_new, mem_new), each (B, 1) f32.
    (Module forward returns (spk, mem_new); syn_new is the hidden state.)
    """
    B = x.shape[0]

    # Lane-dense layout: batch on the lane (last) axis, padded to 128 lanes.
    Bp = ((B + _LANE - 1) // _LANE) * _LANE
    if Bp > _MAX_LANE_TILE:
        tile = _MAX_LANE_TILE
        Bp = ((Bp + tile - 1) // tile) * tile
    else:
        tile = Bp
    num_blocks = Bp // tile
    pad = Bp - B

    def to_row(a):
        return jnp.pad(a.reshape(1, B), ((0, 0), (0, pad)))

    # Pack x / syn / mem into one (3, Bp) slab -> one input DMA per block.
    state = jnp.concatenate([to_row(x), to_row(syn0), to_row(mem0)], axis=0)
    # Pack w / b into one tiny SMEM scalar array -> no VMEM param DMAs.
    params = jnp.concatenate([w.reshape(-1), b.reshape(-1)]).astype(jnp.float32)

    out = pl.pallas_call(
        net_kernel,
        out_shape=jax.ShapeDtypeStruct((3, Bp), jnp.float32),
        grid=(num_blocks,),
        in_specs=[
            pl.BlockSpec(memory_space=pltpu.MemorySpace.SMEM),      # params (whole array)
            pl.BlockSpec((3, tile), lambda i: (0, i)),              # state slab
        ],
        out_specs=pl.BlockSpec((3, tile), lambda i: (0, i)),
        compiler_params=pltpu.CompilerParams(
            # Shards lane-tiles across v7x's 2 TensorCores for large B;
            # harmless for the single-block small-B case.
            dimension_semantics=("parallel",),
        ),
    )(params, state)

    spk = out[0, :B].reshape(B, 1)
    syn_new = out[1, :B].reshape(B, 1)
    mem_new = out[2, :B].reshape(B, 1)
    return spk, syn_new, mem_new


def net_forward_ref(x, w, b, syn0, mem0):
    """Pure-JAX reference for correctness checking."""
    cur1 = x @ w.T + b
    spk = (mem0 - THRESHOLD > 0.0).astype(jnp.float32)
    reset = spk * THRESHOLD
    syn_new = ALPHA * syn0 + cur1
    mem_new = BETA * mem0 + syn_new - reset
    return spk, syn_new, mem_new


if __name__ == "__main__":
    key = jax.random.PRNGKey(0)
    kx, kw, kb = jax.random.split(key, 3)

    # Shapes implied by the module: Linear(1,1), batch_size=1, num_inputs=1.
    B = 1
    x = jax.random.normal(kx, (B, 1), dtype=jnp.float32)
    w = jax.random.uniform(kw, (1, 1), minval=-1.0, maxval=1.0, dtype=jnp.float32)
    b = jax.random.uniform(kb, (1, 1), minval=-1.0, maxval=1.0, dtype=jnp.float32)

    # --- single step from zero hidden state (init_hidden=True) ---
    syn = jnp.zeros((B, 1), dtype=jnp.float32)
    mem = jnp.zeros((B, 1), dtype=jnp.float32)

    spk, syn_n, mem_n = jax.block_until_ready(net_forward(x, w, b, syn, mem))
    spk_r, syn_r, mem_r = net_forward_ref(x, w, b, syn, mem)

    assert spk.shape == (B, 1) and syn_n.shape == (B, 1) and mem_n.shape == (B, 1)
    assert jnp.allclose(spk, spk_r, atol=1e-6)
    assert jnp.allclose(syn_n, syn_r, atol=1e-6)
    assert jnp.allclose(mem_n, mem_r, atol=1e-6)

    # --- short rollout carrying (syn, mem) state, including a spiking step ---
    syn = jnp.zeros((B, 1), dtype=jnp.float32)
    mem = jnp.full((B, 1), 2.0, dtype=jnp.float32)   # above threshold -> spk = 1
    syn_ref, mem_ref_s = syn, mem
    for _ in range(3):
        spk, syn, mem = jax.block_until_ready(net_forward(x, w, b, syn, mem))
        spk_r, syn_ref, mem_ref_s = net_forward_ref(x, w, b, syn_ref, mem_ref_s)
        assert jnp.allclose(spk, spk_r, atol=1e-6)
        assert jnp.allclose(syn, syn_ref, atol=1e-6)
        assert jnp.allclose(mem, mem_ref_s, atol=1e-6)

    print("KERNEL_OK")
</pallas_src>

<mosaic_0001>
module attributes {stable_mosaic.version = 11 : i64} {
  func.func @net_kernel(%arg0: i32, %arg1: memref<2xf32, #tpu.memory_space<smem>>, %arg2: memref<3x128xf32, #tpu.memory_space<vmem>>, %arg3: memref<3x128xf32, #tpu.memory_space<vmem>>) attributes {dimension_semantics = [#tpu.dimension_semantics<parallel>], iteration_bounds = array<i64: 1>, scalar_prefetch = 0 : i64, scratch_operands = 0 : i64, tpu.core_type = #tpu.core_type<tc>, window_params = [{transform_indices = @transform_0, window_bounds = array<i64: 2>}, {transform_indices = @transform_1, window_bounds = array<i64: 3, 128>}, {transform_indices = @transform_2, window_bounds = array<i64: 3, 128>}]} {
    %c0 = arith.constant 0 : index
    %0 = memref.load %arg1[%c0] : memref<2xf32, #tpu.memory_space<smem>>
    %c1 = arith.constant 1 : index
    %1 = memref.load %arg1[%c1] : memref<2xf32, #tpu.memory_space<smem>>
    %c0_0 = arith.constant 0 : index
    %c0_1 = arith.constant 0 : index
    %2 = vector.load %arg2[%c0_0, %c0_1] : memref<3x128xf32, #tpu.memory_space<vmem>>, vector<3x128xf32>
    %3 = vector.extract_strided_slice %2 {offsets = [0, 0], sizes = [1, 128], strides = [1, 1]} : vector<3x128xf32> to vector<1x128xf32>
    %4 = vector.extract_strided_slice %2 {offsets = [1, 0], sizes = [1, 128], strides = [1, 1]} : vector<3x128xf32> to vector<1x128xf32>
    %5 = vector.extract_strided_slice %2 {offsets = [2, 0], sizes = [1, 128], strides = [1, 1]} : vector<3x128xf32> to vector<1x128xf32>
    %6 = vector.broadcast %0 : f32 to vector<1x128xf32>
    %7 = arith.mulf %3, %6 : vector<1x128xf32>
    %8 = vector.broadcast %1 : f32 to vector<1x128xf32>
    %9 = arith.addf %7, %8 : vector<1x128xf32>
    %cst = arith.constant 1.000000e+00 : f32
    %10 = vector.broadcast %cst : f32 to vector<1x128xf32>
    %11 = arith.subf %5, %10 : vector<1x128xf32>
    %cst_2 = arith.constant 0.000000e+00 : f32
    %12 = vector.broadcast %cst_2 : f32 to vector<1x128xf32>
    %13 = arith.cmpf ogt, %11, %12 : vector<1x128xf32>
    %14 = arith.extui %13 : vector<1x128xi1> to vector<1x128xi32>
    %15 = arith.sitofp %14 : vector<1x128xi32> to vector<1x128xf32>
    %cst_3 = arith.constant 1.000000e+00 : f32
    %16 = vector.broadcast %cst_3 : f32 to vector<1x128xf32>
    %17 = arith.mulf %15, %16 : vector<1x128xf32>
    %cst_4 = arith.constant 5.000000e-01 : f32
    %18 = vector.broadcast %cst_4 : f32 to vector<1x128xf32>
    %19 = arith.mulf %18, %4 : vector<1x128xf32>
    %20 = arith.addf %19, %9 : vector<1x128xf32>
    %cst_5 = arith.constant 5.000000e-01 : f32
    %21 = vector.broadcast %cst_5 : f32 to vector<1x128xf32>
    %22 = arith.mulf %21, %5 : vector<1x128xf32>
    %23 = arith.addf %22, %20 : vector<1x128xf32>
    %24 = arith.subf %23, %17 : vector<1x128xf32>
    %25 = tpu.concatenate %15, %20, %24 in 0 : vector<1x128xf32>, vector<1x128xf32>, vector<1x128xf32> -> vector<3x128xf32>
    %c0_6 = arith.constant 0 : index
    %c0_7 = arith.constant 0 : index
    %26 = vector.load %arg3[%c0_6, %c0_7] : memref<3x128xf32, #tpu.memory_space<vmem>>, vector<3x128xf32>
    tpu.vector_store %arg3[%c0_6, %c0_7], %25 {strides = array<i32>} : memref<3x128xf32, #tpu.memory_space<vmem>>, vector<3x128xf32>,
    return
  }
  func.func @transform_0(%arg0: i32) -> i32 {
    %c0_i32 = arith.constant 0 : i32
    %c0_i32_0 = arith.constant 0 : i32
    return %c0_i32 : i32
  }
  func.func @transform_1(%arg0: i32) -> (i32, i32) {
    %c0_i32 = arith.constant 0 : i32
    %c0_i32_0 = arith.constant 0 : i32
    return %c0_i32, %arg0 : i32, i32
  }
  func.func @transform_2(%arg0: i32) -> (i32, i32) {
    %c0_i32 = arith.constant 0 : i32
    %c0_i32_0 = arith.constant 0 : i32
    return %c0_i32, %arg0 : i32, i32
  }
}

</mosaic_0001>

<bundles_post_ra>
// kernel: net_forward.1
= control target key start
LH: loop header
LB: loop body
LE: loop exit
PB: predicated region body
PF: predicated region fallthrough
CT: control target
= control target key end

     0   :  { %7 = vsyncpa [#allocation3], 0  ;;  %s103_s0 = inlined_call_operand.vmem [shape: f32[2], index: 0, kind: input, shape index: {}]   ;;  %s104_s1 = inlined_call_operand.vmem [shape: f32[3,128], index: 1, kind: input, shape index: {}]   ;;  %s105_s2 = inlined_call_operand.vmem [shape: f32[3,128], index: 2, kind: output, shape index: {}]  }
   0x1   :  { %s14_s11 = sshll.u32 %s103_s0, 4  ;;  %s15_s11 = int_to_ptr.vmem [resolvable:$true] %s14_s11 }
   0x2   :  { %s63_s12 = scalar_lea.vmem %s15_s11, 16  ;;  %p68_p1 = scmp.lt.s32.totalorder %s15_s11, %s15_s11 }
   0x3   :  { %p64_p0 = scmp.ne.s32.totalorder %s15_s11, %s63_s12  ;;  %p69_p2 = scmp.lt.s32.totalorder %s63_s12, %s63_s12 }
   0x5   :  { %p70_p3 = por %p69_p2, %p68_p1 }
   0x7   :  { %p71_p4 = pnand %p70_p3, %p64_p0 }
   0x9   :  { %74 = shalt.err (!%p71_p4)
}
   0xa   :  { %s77_s13 = smov [#allocation2]  }
   0xb   :  { %17 = dma.vmem_to_smem %s15_s11, 16, %s77_s13, [#allocation3]  }
   0xc   :  { %75 = dma.done.wait [#allocation3], 16  }
   0xd   :  { %76 = vsyncadd [#allocation3], 4294967280 }
   0xe   :  { %23 = sfence }
   0xf   :  { %s24_s14 = sld [smem:[#allocation2]]  ;;  %v26_v0 = vld [vmem:[%s104_s1] sm:$0x7]  ;;  %v78_v7 = vmov 0.0   ;;  %vm48_vm1 = vcmask 1040384   ;;  %vm50_vm2 = vcmask 1041408  }
  0x10   :  { %s58_s15 = sld [smem:[#allocation2 + $0x1]]  ;;  %v59_v1 = vadd.f32 -1.0, %v26_v0  ;;  %v35_v6 = vmul.f32 0.5, %v26_v0 }
  0x12   :  { %vm32_vm0 = vcmp.gt.f32.partialorder %v59_v1, 0.0 }
  0x13   :  { %v60_v8 = vsel %vm32_vm0, 1.0, %v78_v7 }
  0x14   :  { %v46_v11 = vrot.slane %v60_v8, 2 }
  0x15   :  { %v27_v2 = vstv %s24_s14 }
  0x16   :  { %v28_v3 = vmul.f32 %v27_v2, %v26_v0  ;;  %v29_v4 = vstv %s58_s15 }
  0x18   :  { %v30_v5 = vadd.f32 %v29_v4, %v28_v3 }
  0x1a   :  { %v37_v9 = vrot.slane %v30_v5, 7 }
  0x1c   :  { %v39_v10 = vadd.f32 %v37_v9, %v35_v6 }
  0x1e   :  { %v41_v12 = vrot.slane %v39_v10, 7  ;;  %v49_v14 = vsel %vm48_vm1, %v46_v11, %v39_v10 }
  0x20   :  { %v43_v13 = vadd.f32 %v41_v12, %v35_v6 }
  0x22   :  { %v44_v15 = vsub.f32 %v43_v13, %v60_v8 }
  0x24   :  { %v51_v16 = vsel %vm50_vm2, %v49_v14, %v44_v15 }
  0x25   :  { %52 = vst [vmem:[%s105_s2] sm:$0x7] %v51_v16 }
  0x26   :  { %57 = vsyncpa [#allocation3], 1 }

</bundles_post_ra>
